<compile_context>
chip_gen: v7x
topology: tpu7x:2x2x1
jax: 0.10.0
libtpu: 0.0.40
codegen_flags: <defaults>
</compile_context>

<pallas_src>
import jax
import jax.numpy as jnp
from jax.experimental import pallas as pl
from jax.experimental.pallas import tpu as pltpu

_LANES = 1024  # lane-axis width of the 2-D batch slab (multiple of 128)


def _bloch_sigmoid_kernel(dparams_ref, theta_ref, p0_ref):
    # dparams_ref: SMEM (3,) = [W00-W10, W01-W11, b0-b1]
    # theta_ref:   VMEM (TR, 1024)  -- batch, sublane+lane dense
    # p0_ref:      VMEM (TR, 1024)  -- probability of class 0
    half = theta_ref[...] * 0.5
    c = jnp.cos(half)                      # amplitude of |0>
    s = jnp.sin(half)                      # amplitude of |1>
    d = c * dparams_ref[0] + s * dparams_ref[1] + dparams_ref[2]   # l0 - l1
    # Exact 2-class softmax: p0 = sigmoid(l0 - l1).  (No approx reciprocal.)
    p0_ref[...] = 1.0 / (1.0 + jnp.exp(-d))


def neural_network_forward(x, weight, bias, *, block_rows=256, force_pallas=False):
    """x: (B, 1+) f32; weight: (2, 2) [out, in] as in torch.nn.Linear; bias: (2,)."""
    B = x.shape[0]
    theta = x[:, 0].astype(jnp.float32)
    w = weight.astype(jnp.float32)
    b = bias.astype(jnp.float32)

    # Small-batch fast path: kernel launch + padding cost more than the math.
    if not force_pallas and B < 4096:
        half = theta[:, None] * 0.5
        state = jnp.concatenate([jnp.cos(half), jnp.sin(half)], axis=1)
        return jax.nn.softmax(state @ w.T + b, axis=1)

    # ----- Pallas path: sublane+lane-dense 2-D layout of the batch. -----
    C = _LANES
    r_needed = -(-B // C)                          # rows of C lanes needed
    R = max(8, ((r_needed + 7) // 8) * 8)          # sublane-dense row count
    # Largest block row count <= block_rows that is a multiple of 8 and divides
    # R exactly -> no second round of padding (worst case TR = 8).
    TR = max(8, (min(block_rows, R) // 8) * 8)
    while R % TR != 0:
        TR -= 8

    total = R * C
    if total != B:
        theta = jnp.pad(theta, (0, total - B))
    theta2d = theta.reshape(R, C)

    # 3 SMEM scalars: the kernel only needs the class-0 minus class-1 weights.
    dparams = jnp.stack([w[0, 0] - w[1, 0], w[0, 1] - w[1, 1], b[0] - b[1]])

    p0_2d = pl.pallas_call(
        _bloch_sigmoid_kernel,
        out_shape=jax.ShapeDtypeStruct((R, C), jnp.float32),
        grid=(R // TR,),
        in_specs=[
            pl.BlockSpec(memory_space=pltpu.MemorySpace.SMEM),  # dparams, whole array
            pl.BlockSpec((TR, C), lambda i: (i, 0)),            # theta block
        ],
        out_specs=pl.BlockSpec((TR, C), lambda i: (i, 0)),
        compiler_params=pltpu.CompilerParams(
            dimension_semantics=("parallel",)),
    )(dparams, theta2d)

    # Layout plumbing back to the PyTorch-facing (B, 2) shape (padded lanes
    # computed garbage from theta=0 and are dropped by the [:B] slice).
    p0 = p0_2d.reshape(-1)[:B]
    return jnp.stack([p0, 1.0 - p0], axis=1)


def _reference(x, weight, bias):
    half = x[:, 0:1].astype(jnp.float32) * 0.5
    state = jnp.concatenate([jnp.cos(half), jnp.sin(half)], axis=1)
    logits = state @ weight.T.astype(jnp.float32) + bias.astype(jnp.float32)
    return jax.nn.softmax(logits, axis=1)


if __name__ == "__main__":
    key = jax.random.PRNGKey(0)
    kx, kw, kb, kx2 = jax.random.split(key, 4)

    # Deterministic nn.Linear(2, 2)-style params.
    bound = 1.0 / jnp.sqrt(2.0)
    weight = jax.random.uniform(kw, (2, 2), dtype=jnp.float32, minval=-bound, maxval=bound)
    bias = jax.random.uniform(kb, (2,), dtype=jnp.float32, minval=-bound, maxval=bound)

    # --- small batch, forced through the Pallas kernel (single grid step) ---
    B = 8
    x = jax.random.uniform(kx, (B, 1), dtype=jnp.float32,
                           minval=0.0, maxval=2.0 * jnp.pi)
    out = neural_network_forward(x, weight, bias, force_pallas=True)
    jax.block_until_ready(out)
    ref = _reference(x, weight, bias)
    assert out.shape == (B, 2), out.shape
    assert jnp.allclose(out, ref, atol=1e-4, rtol=1e-4), (out, ref)

    # --- larger batch with padding + multi-step grid through the kernel ---
    B2 = 40 * 1024 - 100
    x2 = jax.random.uniform(kx2, (B2, 1), dtype=jnp.float32,
                            minval=0.0, maxval=2.0 * jnp.pi)
    out2 = neural_network_forward(x2, weight, bias, block_rows=8, force_pallas=True)
    jax.block_until_ready(out2)
    ref2 = _reference(x2, weight, bias)
    assert out2.shape == (B2, 2), out2.shape
    assert jnp.allclose(out2, ref2, atol=1e-4, rtol=1e-4)

    # --- small-batch fast path (pure XLA) agrees too ---
    out_fast = neural_network_forward(x, weight, bias)
    assert jnp.allclose(out_fast, ref, atol=1e-6, rtol=1e-6)

    print("KERNEL_OK")
</pallas_src>

<mosaic_0001>
module attributes {stable_mosaic.version = 11 : i64} {
  func.func @_bloch_sigmoid_kernel(%arg0: i32, %arg1: memref<3xf32, #tpu.memory_space<smem>>, %arg2: memref<8x1024xf32, #tpu.memory_space<vmem>>, %arg3: memref<8x1024xf32, #tpu.memory_space<vmem>>) attributes {dimension_semantics = [#tpu.dimension_semantics<parallel>], iteration_bounds = array<i64: 1>, scalar_prefetch = 0 : i64, scratch_operands = 0 : i64, tpu.core_type = #tpu.core_type<tc>, window_params = [{transform_indices = @transform_0, window_bounds = array<i64: 3>}, {transform_indices = @transform_1, window_bounds = array<i64: 8, 1024>}, {transform_indices = @transform_2, window_bounds = array<i64: 8, 1024>}]} {
    %c0 = arith.constant 0 : index
    %c0_0 = arith.constant 0 : index
    %0 = vector.load %arg2[%c0, %c0_0] : memref<8x1024xf32, #tpu.memory_space<vmem>>, vector<8x1024xf32>
    %cst = arith.constant 5.000000e-01 : f32
    %1 = vector.broadcast %cst : f32 to vector<8x1024xf32>
    %2 = arith.mulf %0, %1 : vector<8x1024xf32>
    %3 = math.cos %2 : vector<8x1024xf32>
    %4 = math.sin %2 : vector<8x1024xf32>
    %c0_1 = arith.constant 0 : index
    %5 = memref.load %arg1[%c0_1] : memref<3xf32, #tpu.memory_space<smem>>
    %6 = vector.broadcast %5 : f32 to vector<8x1024xf32>
    %7 = arith.mulf %3, %6 : vector<8x1024xf32>
    %c1 = arith.constant 1 : index
    %8 = memref.load %arg1[%c1] : memref<3xf32, #tpu.memory_space<smem>>
    %9 = vector.broadcast %8 : f32 to vector<8x1024xf32>
    %10 = arith.mulf %4, %9 : vector<8x1024xf32>
    %11 = arith.addf %7, %10 : vector<8x1024xf32>
    %c2 = arith.constant 2 : index
    %12 = memref.load %arg1[%c2] : memref<3xf32, #tpu.memory_space<smem>>
    %13 = vector.broadcast %12 : f32 to vector<8x1024xf32>
    %14 = arith.addf %11, %13 : vector<8x1024xf32>
    %cst_2 = arith.constant 0.000000e+00 : f32
    %15 = vector.broadcast %cst_2 : f32 to vector<8x1024xf32>
    %16 = arith.subf %15, %14 : vector<8x1024xf32>
    %17 = math.exp %16 : vector<8x1024xf32>
    %cst_3 = arith.constant 1.000000e+00 : f32
    %18 = vector.broadcast %cst_3 : f32 to vector<8x1024xf32>
    %19 = arith.addf %18, %17 : vector<8x1024xf32>
    %cst_4 = arith.constant 1.000000e+00 : f32
    %20 = vector.broadcast %cst_4 : f32 to vector<8x1024xf32>
    %21 = arith.divf %20, %19 : vector<8x1024xf32>
    %c0_5 = arith.constant 0 : index
    %c0_6 = arith.constant 0 : index
    %22 = vector.load %arg3[%c0_5, %c0_6] : memref<8x1024xf32, #tpu.memory_space<vmem>>, vector<8x1024xf32>
    tpu.vector_store %arg3[%c0_5, %c0_6], %21 {strides = array<i32>} : memref<8x1024xf32, #tpu.memory_space<vmem>>, vector<8x1024xf32>,
    return
  }
  func.func @transform_0(%arg0: i32) -> i32 {
    %c0_i32 = arith.constant 0 : i32
    %c0_i32_0 = arith.constant 0 : i32
    return %c0_i32 : i32
  }
  func.func @transform_1(%arg0: i32) -> (i32, i32) {
    %c0_i32 = arith.constant 0 : i32
    %c0_i32_0 = arith.constant 0 : i32
    return %arg0, %c0_i32 : i32, i32
  }
  func.func @transform_2(%arg0: i32) -> (i32, i32) {
    %c0_i32 = arith.constant 0 : i32
    %c0_i32_0 = arith.constant 0 : i32
    return %arg0, %c0_i32 : i32, i32
  }
}

</mosaic_0001>

<bundles_post_ra>
// kernel: tpu_custom_call.1
= control target key start
LH: loop header
LB: loop body
LE: loop exit
PB: predicated region body
PF: predicated region fallthrough
CT: control target
= control target key end

     0   :  { %7 = vsyncpa [#allocation5], 0  ;;  %s3017_s0 = inlined_call_operand.hbm [shape: f32[3], index: 0, kind: input, shape index: {}]   ;;  %s3018_s1 = inlined_call_operand.hbm [shape: f32[8,1024], index: 1, kind: input, shape index: {}]   ;;  %s3019_s2 = inlined_call_operand.hbm [shape: f32[8,1024], index: 2, kind: output, shape index: {}]  }
   0x1   :  { %8 = vsyncpa [#allocation3], 0 }
   0x2   :  { %9 = vsyncpa [#allocation4], 0  ;;  %s1988_s11 = scalar_lea.hbm %s3017_s0, 16 }
   0x3   :  { %p1989_p0 = scmp.ne.s32.totalorder %s3017_s0, %s1988_s11  ;;  %p1992_p1 = scmp.lt.u32.totalorder %s1988_s11, %s3017_s0 }
   0x5   :  { %p1994_p2 = pnand %p1992_p1, %p1989_p0 }
   0x7   :  { %1997 = shalt.err (!%p1994_p2)
}
   0x8   :  { %s2048_s16 = smov [#allocation2]   ;;  %s2049_s19 = smov [#allocation6]  }
   0x9   :  { %17 = dma.hbm_to_smem %s3017_s0, 16, %s2048_s16, [#allocation5]  }
   0xa   :  { %s24_s20 = sshll.u32 %s2049_s19, 4  ;;  %s1998_s23 = scalar_lea.hbm %s3018_s1, 1024  ;;  %s25_s20 = int_to_ptr.vmem [resolvable:$true] %s24_s20 }
   0xb   :  { %p1999_p3 = scmp.ne.s32.totalorder %s3018_s1, %s1998_s23  ;;  %p2002_p4 = scmp.lt.u32.totalorder %s1998_s23, %s3018_s1 }
   0xd   :  { %p2004_p5 = pnand %p2002_p4, %p1999_p3 }
   0xf   :  { %2007 = shalt.err (!%p2004_p5)
}
  0x10   :  { %s2008_s28 = scalar_lea.vmem %s25_s20, 1024  ;;  %p2013_p7 = scmp.lt.s32.totalorder %s25_s20, %s25_s20 }
  0x11   :  { %p2009_p6 = scmp.ne.s32.totalorder %s25_s20, %s2008_s28  ;;  %p2014_p8 = scmp.lt.s32.totalorder %s2008_s28, %s2008_s28 }
  0x13   :  { %p2015_p9 = por %p2014_p8, %p2013_p7 }
  0x15   :  { %p2016_p10 = pnand %p2015_p9, %p2009_p6 }
  0x17   :  { %2019 = shalt.err (!%p2016_p10)
}
  0x18   :  { %27 = dma.hbm_to_vmem [thread:$0]  %s3018_s1, 1024, %s25_s20, [#allocation3]  }
  0x19   :  { %2042 = dma.done.wait [#allocation5], 16  }
  0x1a   :  { %2043 = vsyncadd [#allocation5], 4294967280 }
  0x1b   :  { %2044 = dma.done.wait [#allocation3], 1024  }
  0x1c   :  { %2045 = vsyncadd [#allocation3], 4294966272 }
  0x1d   :  { %34 = sfence }
  0x1e   :  { %v35_v0 = vld [vmem:[#allocation6] sm:$0xff]  ;;  %v36_v1 = vld [vmem:[#allocation6 + $0x8] sm:$0xff]  ;;  %v37_v2 = vld [vmem:[#allocation6 + $0x10] sm:$0xff]  ;;  %v2050_v31 = vmov 683565275   ;;  %s2875_s1 = sld [smem:[#allocation2]] }
  0x1f   :  { %v2096_v3 = vmul.f32 0.5, %v35_v0  ;;  %v2098_v4 = vmul.f32 0.5, %v36_v1  ;;  %v2101_v6 = vmul.f32 0.5, %v37_v2  ;;  %v38_v14 = vld [vmem:[#allocation6 + $0x18] sm:$0xff]  ;;  %v2051_v33 = vmov 2475754826  }
  0x20   :  { %v2111_v22 = vmul.f32 0.5, %v38_v14  ;;  %v3029_v35 = vmov 2131351028   ;;  %v3027_v37 = vmov 2102212464   ;;  %s2911_s30 = sld [smem:[#allocation2 + $0x1]] }
  0x21   :  { %v51_v5 = vand.u32 2147483647, %v2096_v3  ;;  %v54_v7 = vand.u32 2139095040, %v2096_v3  ;;  %v154_v10 = vand.u32 2147483647, %v2098_v4  ;;  %v157_v11 = vand.u32 2139095040, %v2098_v4 }
  0x22   :  { %v260_v13 = vand.u32 2139095040, %v2101_v6  ;;  %v2054_v39 = vmov 920167782   ;;  %v2055_v46 = vmov 1326507024   ;;  %s2959_s3 = sld [smem:[#allocation2 + $0x2]] }
  0x23   :  { %v55_v8 = vshrl.u32 %v54_v7, 23  ;;  %v58_v9 = vand.u32 8388607, %v51_v5  ;;  %v158_v15 = vshrl.u32 %v157_v11, 23  ;;  %v161_v16 = vand.u32 8388607, %v154_v10 }
  0x24   :  { %v261_v21 = vshrl.u32 %v260_v13, 23  ;;  %s2056_s4 = smov [#allocation7]  }
  0x25   :  { %v1817_v12 = vadd.s32 4294967169, %v55_v8  ;;  %v59_v18 = vor.u32 8388608, %v58_v9  ;;  %v1821_v19 = vadd.s32 4294967169, %v158_v15  ;;  %v162_v20 = vor.u32 8388608, %v161_v16  ;;  %s1807_s5 = sshll.u32 %s2056_s4, 4  ;;  %s1808_s5 = int_to_ptr.vmem [resolvable:$true] %s1807_s5 }
  0x26   :  { %v2117_v29 = vadd.s32 4294967169, %v261_v21  ;;  %s2020_s6 = scalar_lea.vmem %s1808_s5, 1024  ;;  %p2025_p12 = scmp.lt.s32.totalorder %s1808_s5, %s1808_s5 }
  0x27   :  { %v61_v17 = vadd.s32 1, %v1817_v12  ;;  %v164_v24 = vadd.s32 1, %v1821_v19  ;;  %v2113_v27 = vshll.u32 %v59_v18, 8  ;;  %v2115_v28 = vshll.u32 %v162_v20, 8  ;;  %p2021_p11 = scmp.ne.s32.totalorder %s1808_s5, %s2020_s6  ;;  %p2026_p13 = scmp.lt.s32.totalorder %s2020_s6, %s2020_s6 }
  0x29   :  { %vm62_vm0 = vcmp.gt.s32.totalorder %v61_v17, 0  ;;  %vm165_vm1 = vcmp.gt.s32.totalorder %v164_v24, 0  ;;  %p2027_p0 = por %p2026_p13, %p2025_p12 }
  0x2a   :  { %v63_v23 = vsel %vm62_vm0, %v61_v17, 0  ;;  %v166_v51 = vsel %vm165_vm1, %v164_v24, 0 }
  0x2b   :  { %v64_v25 = vshrl.u32 %v63_v23, 5  ;;  %v65_v26 = vand.u32 31, %v63_v23  ;;  %v167_v54 = vshrl.u32 %v166_v51, 5  ;;  %v168_v55 = vand.u32 31, %v166_v51  ;;  %p2028_p1 = pnand %p2027_p0, %p2021_p11 }
  0x2d   :  { %v66_v30 = vsub.s32 32, %v65_v26  ;;  %v68_v32 = vshll.u32 %v2050_v31, %v65_v26  ;;  %v71_v34 = vshll.u32 %v2051_v33, %v65_v26  ;;  %v74_v36 = vshll.u32 %v3029_v35, %v65_v26 }
  0x2e   :  { %v77_v38 = vshll.u32 %v3027_v37, %v65_v26  ;;  %v80_v40 = vshll.u32 %v2054_v39, %v65_v26  ;;  %vm83_vm2 = vcmp.lt.s32.totalorder %v64_v25, 1  ;;  %vm84_vm3 = vcmp.lt.s32.totalorder %v64_v25, 2 }
  0x2f   :  { %v67_v41 = vshrl.u32 %v2050_v31, %v66_v30  ;;  %v69_v42 = vshrl.u32 %v2051_v33, %v66_v30  ;;  %v72_v43 = vshrl.u32 %v3029_v35, %v66_v30  ;;  %v75_v44 = vshrl.u32 %v3027_v37, %v66_v30 }
  0x30   :  { %v78_v45 = vshrl.u32 %v2054_v39, %v66_v30  ;;  %v81_v47 = vshrl.u32 %v2055_v46, %v66_v30  ;;  %vm85_vm4 = vcmp.lt.s32.totalorder %v64_v25, 3  ;;  %vm86_vm5 = vcmp.lt.s32.totalorder %v64_v25, 4 }
  0x31   :  { %v70_v48 = vor.u32 %v69_v42, %v68_v32  ;;  %v73_v49 = vor.u32 %v72_v43, %v71_v34  ;;  %v76_v50 = vor.u32 %v75_v44, %v74_v36  ;;  %v169_v63 = vsub.s32 32, %v168_v55 }
  0x32   :  { %v79_v52 = vor.u32 %v78_v45, %v77_v38  ;;  %v82_v53 = vor.u32 %v81_v47, %v80_v40  ;;  %v171_v7 = vshll.u32 %v2050_v31, %v168_v55  ;;  %v174_v18 = vshll.u32 %v2051_v33, %v168_v55 }
  0x33   :  { %v87_v56 = vsel %vm83_vm2, %v67_v41, %v70_v48  ;;  %v88_v57 = vsel %vm86_vm5, %v76_v50, 2102212464  ;;  %v91_v58 = vsel %vm83_vm2, %v70_v48, %v73_v49  ;;  %v95_v59 = vsel %vm83_vm2, %v73_v49, %v76_v50 }
  0x34   :  { %v89_v60 = vsel %vm85_vm4, %v73_v49, %v88_v57  ;;  %v92_v61 = vsel %vm86_vm5, %v79_v52, 920167782  ;;  %v96_v62 = vsel %vm86_vm5, %v82_v53, 1326507024  ;;  %v170_v12 = vshrl.u32 %v2050_v31, %v169_v63 }
  0x35   :  { %v90_v0 = vsel %vm84_vm3, %v87_v56, %v89_v60  ;;  %v93_v1 = vsel %vm85_vm4, %v76_v50, %v92_v61  ;;  %v97_v2 = vsel %vm85_vm4, %v79_v52, %v96_v62  ;;  %v172_v17 = vshrl.u32 %v2051_v33, %v169_v63 }
  0x36   :  { %v94_v8 = vsel %vm84_vm3, %v91_v58, %v93_v1  ;;  %v98_v9 = vsel %vm84_vm3, %v95_v59, %v97_v2  ;;  %v106_v11 = vmul.u32 %v2113_v27, %v90_v0  ;;  %v175_v19 = vshrl.u32 %v3029_v35, %v169_v63 }
  0x37   :  { %v2144_v13 = vmul.u32.u64.low %v2113_v27, %v98_v9  ;;  %v2145_v14 = vmul.u32.u64.high %v2113_v27, %v98_v9, %v2144_v13  ;;  %v2148_v15 = vmul.u32.u64.low %v2113_v27, %v94_v8  ;;  %v2149_v16 = vmul.u32.u64.high %v2113_v27, %v94_v8, %v2148_v15 }
  0x38   :  { %v177_v20 = vshll.u32 %v3029_v35, %v168_v55  ;;  %v178_v21 = vshrl.u32 %v3027_v37, %v169_v63  ;;  %v180_v23 = vshll.u32 %v3027_v37, %v168_v55  ;;  %v181_v24 = vshrl.u32 %v2054_v39, %v169_v63 }
  0x39   :  { %v183_v25 = vshll.u32 %v2054_v39, %v168_v55  ;;  %v173_v26 = vor.u32 %v172_v17, %v171_v7  ;;  %v176_v27 = vor.u32 %v175_v19, %v174_v18  ;;  %v184_v30 = vshrl.u32 %v2055_v46, %v169_v63 }
  0x3a   :  { %vm186_vm6 = vcmp.lt.s32.totalorder %v167_v54, 1  ;;  %vm108_vm7 = vc.u32 %v2145_v14, %v2148_v15  ;;  %v109_v32 = vadd.s32 1, %v2149_v16  ;;  %v179_v34 = vor.u32 %v178_v21, %v177_v20 }
  0x3b   :  { %v267_v36 = vadd.s32 1, %v2117_v29  ;;  %v182_v38 = vor.u32 %v181_v24, %v180_v23  ;;  %v185_v40 = vor.u32 %v184_v30, %v183_v25  ;;  %vm187_vm8 = vcmp.lt.s32.totalorder %v167_v54, 2 }
  0x3c   :  { %vm188_vm9 = vcmp.lt.s32.totalorder %v167_v54, 3  ;;  %v110_v41 = vsel %vm108_vm7, %v109_v32, %v2149_v16  ;;  %vm189_vm10 = vcmp.lt.s32.totalorder %v167_v54, 4  ;;  %v190_v42 = vsel %vm186_vm6, %v170_v12, %v173_v26 }
  0x3d   :  { %v194_v43 = vsel %vm186_vm6, %v173_v26, %v176_v27  ;;  %v111_v44 = vadd.s32 %v110_v41, %v106_v11  ;;  %v191_v45 = vsel %vm189_vm10, %v179_v34, 2102212464  ;;  %v195_v47 = vsel %vm189_vm10, %v182_v38, 920167782 }
  0x3e   :  { %v198_v48 = vsel %vm186_vm6, %v176_v27, %v179_v34  ;;  %v192_v49 = vsel %vm188_vm9, %v176_v27, %v191_v45  ;;  %v196_v50 = vsel %vm188_vm9, %v179_v34, %v195_v47  ;;  %v199_v51 = vsel %vm189_vm10, %v185_v40, 1326507024 }
  0x3f   :  { %vm268_vm11 = vcmp.gt.s32.totalorder %v267_v36, 0  ;;  %v112_v29 = vadd.s32 536870912, %v111_v44  ;;  %v197_v52 = vsel %vm187_vm8, %v194_v43, %v196_v50  ;;  %v200_v53 = vsel %vm188_vm9, %v182_v38, %v199_v51 }
  0x40   :  { %v257_v55 = vand.u32 2147483647, %v2101_v6  ;;  %v193_v56 = vsel %vm187_vm8, %v190_v42, %v192_v49  ;;  %v201_v57 = vsel %vm187_vm8, %v198_v48, %v200_v53  ;;  %v269_v63 = vsel %vm268_vm11, %v267_v36, 0 }
  0x41   :  { %v2174_v58 = vmul.u32.u64.low %v2115_v28, %v197_v52  ;;  %v2175_v59 = vmul.u32.u64.high %v2115_v28, %v197_v52, %v2174_v58  ;;  %v2178_v60 = vshrl.u32 %v112_v29, 30  ;;  %v271_v0 = vand.u32 31, %v269_v63 }
  0x42   :  { %v2181_v61 = vmul.u32.u64.low %v2115_v28, %v201_v57  ;;  %v2182_v62 = vmul.u32.u64.high %v2115_v28, %v201_v57, %v2181_v61  ;;  %v209_v2 = vmul.u32 %v2115_v28, %v193_v56  ;;  %v264_v54 = vand.u32 8388607, %v257_v55 }
  0x43   :  { %v114_v1 = vshll.u32 %v2178_v60, 30  ;;  %v212_v7 = vadd.s32 1, %v2175_v59  ;;  %v363_v8 = vand.u32 2139095040, %v2111_v22  ;;  %v272_v11 = vsub.s32 32, %v271_v0 }
  0x44   :  { %vm211_vm12 = vc.u32 %v2182_v62, %v2174_v58  ;;  %v265_v17 = vor.u32 8388608, %v264_v54  ;;  %v270_v18 = vshrl.u32 %v269_v63, 5  ;;  %v274_v28 = vshll.u32 %v2050_v31, %v271_v0 }
  0x45   :  { %v115_v9 = vsub.s32 %v111_v44, %v114_v1  ;;  %v213_v12 = vsel %vm211_vm12, %v212_v7, %v2175_v59  ;;  %v283_v19 = vshll.u32 %v3027_v37, %v271_v0  ;;  %v364_v20 = vshrl.u32 %v363_v8, 23 }
  0x46   :  { %v214_v16 = vadd.s32 %v213_v12, %v209_v2  ;;  %v275_v23 = vshrl.u32 %v2051_v33, %v272_v11  ;;  %v277_v24 = vshll.u32 %v2051_v33, %v271_v0  ;;  %v278_v25 = vshrl.u32 %v3029_v35, %v272_v11 }
  0x47   :  { %v117_v13 = vsub.s32 0, %v115_v9  ;;  %v280_v27 = vshll.u32 %v3029_v35, %v271_v0  ;;  %v281_v30 = vshrl.u32 %v3027_v37, %v272_v11  ;;  %v284_v32 = vshrl.u32 %v2054_v39, %v272_v11 }
  0x48   :  { %v215_v26 = vadd.s32 536870912, %v214_v16  ;;  %v286_v36 = vshll.u32 %v2054_v39, %v271_v0  ;;  %v287_v38 = vshrl.u32 %v2055_v46, %v272_v11  ;;  %v2203_v40 = vshll.u32 %v265_v17, 8 }
  0x49   :  { %v1818_v21 = vmin.u32 %v117_v13, %v115_v9  ;;  %v107_v41 = vadd.s32 %v2148_v15, %v2145_v14  ;;  %v285_v43 = vor.u32 %v284_v32, %v283_v19  ;;  %v1829_v44 = vadd.s32 4294967169, %v364_v20 }
  0x4a   :  { %v2207_v42 = vshrl.u32 %v215_v26, 30  ;;  %v276_v47 = vor.u32 %v275_v23, %v274_v28  ;;  %v279_v48 = vor.u32 %v278_v25, %v277_v24  ;;  %vm292_vm13 = vcmp.lt.s32.totalorder %v270_v18, 4 }
  0x4b   :  { %v119_v34 = vclz %v1818_v21  ;;  %v282_v50 = vor.u32 %v281_v30, %v280_v27  ;;  %v288_v51 = vor.u32 %v287_v38, %v286_v36  ;;  %vm289_vm14 = vcmp.lt.s32.totalorder %v270_v18, 1  ;;  %v39_v38 = vld [vmem:[#allocation6 + $0x20] sm:$0xff] }
  0x4c   :  { %v217_v49 = vshll.u32 %v2207_v42, 30  ;;  %v273_v29 = vshrl.u32 %v2050_v31, %v272_v11  ;;  %vm291_vm0 = vcmp.lt.s32.totalorder %v270_v18, 3  ;;  %v298_v52 = vsel %vm292_vm13, %v285_v43, 920167782 }
  0x4d   :  { %v1819_v45 = vadd.s32 4294967294, %v119_v34  ;;  %vm290_vm1 = vcmp.lt.s32.totalorder %v270_v18, 2  ;;  %v294_v53 = vsel %vm292_vm13, %v282_v50, 2102212464  ;;  %v297_v61 = vsel %vm289_vm14, %v276_v47, %v279_v48 }
  0x4e   :  { %v2212_v15 = vsub.s32 %v214_v16, %v217_v49  ;;  %v299_v0 = vsel %vm291_vm0, %v282_v50, %v298_v52  ;;  %v301_v1 = vsel %vm289_vm14, %v279_v48, %v282_v50  ;;  %v302_v2 = vsel %vm292_vm13, %v288_v51, 1326507024  ;;  %v41_v49 = vld [vmem:[#allocation6 + $0x30] sm:$0xff] }
  0x4f   :  { %vm1820_vm15 = vcmp.lt.s32.totalorder %v1819_v45, 0  ;;  %v303_v8 = vsel %vm291_vm0, %v285_v43, %v302_v2  ;;  %v293_v12 = vsel %vm289_vm14, %v273_v29, %v276_v47  ;;  %v300_v13 = vsel %vm290_vm1, %v297_v61, %v299_v0 }
  0x50   :  { %v122_v14 = vsel %vm1820_vm15, 0, %v1819_v45  ;;  %v220_v63 = vsub.s32 0, %v2212_v15  ;;  %v304_v28 = vsel %vm290_vm1, %v301_v1, %v303_v8  ;;  %v370_v23 = vadd.s32 1, %v1829_v44 }
  0x51   :  { %v123_v56 = vsub.s32 32, %v122_v14  ;;  %v124_v57 = vshll.u32 %v115_v9, %v122_v14  ;;  %v127_v59 = vsub.s32 4294967266, %v122_v14  ;;  %v295_v9 = vsel %vm291_vm0, %v279_v48, %v294_v53  ;;  %v40_v48 = vld [vmem:[#allocation6 + $0x28] sm:$0xff] }
  0x52   :  { %v1822_v11 = vmin.u32 %v220_v63, %v2212_v15  ;;  %v2227_v20 = vmul.u32.u64.low %v2203_v40, %v304_v28  ;;  %v2228_v21 = vmul.u32.u64.high %v2203_v40, %v304_v28, %v2227_v20  ;;  %v296_v25 = vsel %vm290_vm1, %v293_v12, %v295_v9 }
  0x53   :  { %v125_v54 = vshrl.u32 %v107_v41, %v123_v56  ;;  %v128_v7 = vadd.s32 127, %v127_v59  ;;  %v2232_v26 = vmul.u32.u64.low %v2203_v40, %v300_v13  ;;  %v2233_v27 = vmul.u32.u64.high %v2203_v40, %v300_v13, %v2232_v26 }
  0x54   :  { %v222_v19 = vclz %v1822_v11  ;;  %vm371_vm2 = vcmp.gt.s32.totalorder %v370_v23, 0  ;;  %v210_v41 = vadd.s32 %v2174_v58, %v2182_v62  ;;  %v312_v43 = vmul.u32 %v2203_v40, %v296_v25 }
  0x55   :  { %v126_v16 = vor.u32 %v125_v54, %v124_v57  ;;  %v129_v17 = vshll.u32 %v128_v7, 23  ;;  %v372_v36 = vsel %vm371_vm2, %v370_v23, 0  ;;  %vm314_vm4 = vc.u32 %v2228_v21, %v2232_v26 }
  0x56   :  { %v1823_v32 = vadd.s32 4294967294, %v222_v19  ;;  %v315_v44 = vadd.s32 1, %v2233_v27  ;;  %v360_v45 = vand.u32 2147483647, %v2111_v22  ;;  %v374_v47 = vand.u32 31, %v372_v36 }
  0x57   :  { %v130_v24 = vor.u32 4788187, %v129_v17  ;;  %v133_v30 = vcvt.s32.f32 %v126_v16  ;;  %v2243_v52 = vmul.f32 0.5, %v39_v38  ;;  %v2247_v57 = vmul.f32 0.5, %v40_v48 }
  0x58   :  { %vm1824_vm3 = vcmp.lt.s32.totalorder %v1823_v32, 0  ;;  %v316_v58 = vsel %vm314_vm4, %v315_v44, %v2233_v27  ;;  %v375_v62 = vsub.s32 32, %v374_v47  ;;  %v2249_v59 = vmul.f32 0.5, %v41_v49  ;;  %v42_v49 = vld [vmem:[#allocation6 + $0x38] sm:$0xff] }
  0x59   :  { %v131_v34 = vand.u32 2147483647, %v130_v24  ;;  %v225_v18 = vsel %vm1824_vm3, 0, %v1823_v32  ;;  %v317_v56 = vadd.s32 %v316_v58, %v312_v43  ;;  %vm53_vm5 = vcmp.lt.s32.totalorder %v2096_v3, 0 }
  0x5a   :  { %v226_v51 = vsub.s32 32, %v225_v18  ;;  %v230_v29 = vsub.s32 4294967266, %v225_v18  ;;  %v227_v40 = vshll.u32 %v2212_v15, %v225_v18  ;;  %v367_v61 = vand.u32 8388607, %v360_v45 }
  0x5b   :  { %v134_v50 = vmul.f32 %v133_v30, %v131_v34  ;;  %v318_v1 = vadd.s32 536870912, %v317_v56  ;;  %v2254_v2 = vshrl.u32 %v372_v36, 5  ;;  %v377_v54 = vshll.u32 %v2050_v31, %v374_v47 }
  0x5c   :  { %v228_v14 = vshrl.u32 %v210_v41, %v226_v51  ;;  %v231_v53 = vadd.s32 127, %v230_v29  ;;  %v378_v15 = vshrl.u32 %v2051_v33, %v375_v62  ;;  %v380_v7 = vshll.u32 %v2051_v33, %v374_v47 }
  0x5d   :  { %v135_v63 = vxor.u32 2147483648, %v134_v50  ;;  %v381_v8 = vshrl.u32 %v3029_v35, %v375_v62  ;;  %v2260_v9 = vshrl.u32 %v318_v1, 30  ;;  %v383_v13 = vshll.u32 %v3029_v35, %v374_v47 }
  0x5e   :  { %v232_v0 = vshll.u32 %v231_v53, 23  ;;  %v229_v11 = vor.u32 %v228_v14, %v227_v40  ;;  %v384_v16 = vshrl.u32 %v3027_v37, %v375_v62  ;;  %v386_v17 = vshll.u32 %v3027_v37, %v374_v47 }
  0x5f   :  { %v387_v28 = vshrl.u32 %v2054_v39, %v375_v62  ;;  %v389_v19 = vshll.u32 %v2054_v39, %v374_v47  ;;  %vm2269_vm6 = vcmp.le.f32.partialorder %v51_v5, 0.7853982  ;;  %v320_v23 = vshll.u32 %v2260_v9, 30 }
  0x60   :  { %v233_v12 = vor.u32 4788187, %v232_v0  ;;  %v368_v24 = vor.u32 8388608, %v367_v61  ;;  %v390_v25 = vshrl.u32 %v2055_v46, %v375_v62  ;;  %v136_v27 = vsel %vm53_vm5, %v135_v63, %v134_v50 }
  0x61   :  { %v137_v30 = vsub.s32 4, %v2178_v60  ;;  %v388_v32 = vor.u32 %v387_v28, %v386_v17  ;;  %vm392_vm7 = vcmp.lt.s32.totalorder %v2254_v2, 1  ;;  %v2279_v34 = vsub.s32 %v317_v56, %v320_v23 }
  0x62   :  { %v379_v36 = vor.u32 %v378_v15, %v377_v54  ;;  %v382_v5 = vor.u32 %v381_v8, %v380_v7  ;;  %v391_v38 = vor.u32 %v390_v25, %v389_v19  ;;  %v234_v41 = vand.u32 2147483647, %v233_v12 }
  0x63   :  { %v236_v43 = vcvt.s32.f32 %v229_v11  ;;  %v385_v18 = vor.u32 %v384_v16, %v383_v13  ;;  %vm395_vm8 = vcmp.lt.s32.totalorder %v2254_v2, 4  ;;  %v139_v44 = vsel %vm2269_vm6, %v2096_v3, %v136_v27 }
  0x64   :  { %v323_v47 = vsub.s32 0, %v2279_v34  ;;  %vm394_vm9 = vcmp.lt.s32.totalorder %v2254_v2, 3  ;;  %v2287_v48 = vshll.u32 %v368_v24, 8  ;;  %v376_v50 = vshrl.u32 %v2050_v31, %v375_v62 }
  0x65   :  { %vm393_vm10 = vcmp.lt.s32.totalorder %v2254_v2, 2  ;;  %v401_v51 = vsel %vm395_vm8, %v388_v32, 920167782  ;;  %v466_v29 = vand.u32 2139095040, %v2243_v52  ;;  %v397_v40 = vsel %vm395_vm8, %v385_v18, 2102212464 }
  0x66   :  { %v1826_v58 = vmin.u32 %v323_v47, %v2279_v34  ;;  %v400_v14 = vsel %vm392_vm7, %v379_v36, %v382_v5  ;;  %v405_v53 = vsel %vm395_vm8, %v391_v38, 1326507024  ;;  %1924 = vcosq.f32 %v139_v44 }
  0x67   :  { %v237_v56 = vmul.f32 %v236_v43, %v234_v41  ;;  %v402_v61 = vsel %vm394_vm9, %v385_v18, %v401_v51  ;;  %v404_v62 = vsel %vm392_vm7, %v382_v5, %v385_v18  ;;  %v2299_v63 = vmul.f32 0.5, %v42_v49 }
  0x68   :  { %1926 = vsinq.f32 %v139_v44  ;;  %vm156_vm11 = vcmp.lt.s32.totalorder %v2098_v4, 0  ;;  %v325_v0 = vclz %v1826_v58  ;;  %v396_v1 = vsel %vm392_vm7, %v376_v50, %v379_v36 }
  0x69   :  { %v398_v54 = vsel %vm394_vm9, %v382_v5, %v397_v40  ;;  %v403_v15 = vsel %vm393_vm10, %v400_v14, %v402_v61  ;;  %v406_v7 = vsel %vm394_vm9, %v388_v32, %v405_v53  ;;  %v138_v8 = vsel %vm53_vm5, %v137_v30, %v2178_v60 }
  0x6a   :  { %v1827_v11 = vadd.s32 4294967294, %v325_v0  ;;  %v407_v12 = vsel %vm393_vm10, %v404_v62, %v406_v7  ;;  %v467_v13 = vshrl.u32 %v466_v29, 23  ;;  %v238_v16 = vxor.u32 2147483648, %v237_v56 }
  0x6b   :  { %v313_v17 = vadd.s32 %v2232_v26, %v2228_v21  ;;  %v2318_v28 = vmul.u32.u64.low %v2287_v48, %v407_v12  ;;  %v2319_v19 = vmul.u32.u64.high %v2287_v48, %v407_v12, %v2318_v28  ;;  %v399_v23 = vsel %vm393_vm10, %v396_v1, %v398_v54 }
  0x6c   :  { %vm1828_vm12 = vcmp.lt.s32.totalorder %v1827_v11, 0  ;;  %v2324_v24 = vmul.u32.u64.low %v2287_v48, %v403_v15  ;;  %v2325_v60 = vmul.u32.u64.high %v2287_v48, %v403_v15, %v2324_v24  ;;  %v2330_v25 = vsel %vm2269_vm6, 0, %v138_v8 }
  0x6d   :  { %v240_v27 = vsub.s32 4, %v2207_v42  ;;  %v328_v21 = vsel %vm1828_vm12, 0, %v1827_v11  ;;  %v1833_v26 = vadd.s32 4294967169, %v467_v13  ;;  %v2334_v30 = vand.u32 3, %v2330_v25 }
  0x6e   :  { %vm2338_vm13 = vcmp.le.f32.partialorder %v154_v10, 0.7853982  ;;  %v329_v32 = vsub.s32 32, %v328_v21  ;;  %v333_v36 = vsub.s32 4294967266, %v328_v21  ;;  %v330_v5 = vshll.u32 %v2279_v34, %v328_v21 }
  0x6f   :  { %v415_v20 = vmul.u32 %v2287_v48, %v399_v23  ;;  %vm417_vm14 = vc.u32 %v2319_v19, %v2324_v24  ;;  %v473_v38 = vadd.s32 1, %v1833_v26  ;;  %v239_v41 = vsel %vm156_vm11, %v238_v16, %v237_v56 }
  0x70   :  { %v331_v43 = vshrl.u32 %v313_v17, %v329_v32  ;;  %v334_v18 = vadd.s32 127, %v333_v36  ;;  %v418_v10 = vadd.s32 1, %v2325_v60  ;;  %v2349_v44 = vpop.eup %1924  ;;  %v241_v47 = vsel %vm156_vm11, %v240_v27, %v2207_v42 }
  0x71   :  { %vm259_vm15 = vcmp.lt.s32.totalorder %v2101_v6, 0  ;;  %v463_v34 = vand.u32 2147483647, %v2243_v52  ;;  %vm474_vm0 = vcmp.gt.s32.totalorder %v473_v38, 0  ;;  %v343_v50 = vsub.s32 4, %v2260_v9 }
  0x72   :  { %v2356_v48 = vpop.eup %1926  ;;  %v335_v49 = vshll.u32 %v334_v18, 23  ;;  %v419_v51 = vsel %vm417_vm14, %v418_v10, %v2325_v60  ;;  %v475_v29 = vsel %vm474_vm0, %v473_v38, 0  ;;  %v242_v58 = vsel %vm2338_vm13, %v2098_v4, %v239_v41 }
  0x73   :  { %v332_v40 = vor.u32 %v331_v43, %v330_v5  ;;  %v420_v14 = vadd.s32 %v419_v51, %v415_v20  ;;  %v477_v42 = vand.u32 31, %v475_v29  ;;  %vm146_vm1 = vcmp.eq.s32.totalorder %v2334_v30, 0 }
  0x74   :  { %vm149_vm2 = vcmp.eq.s32.totalorder %v2334_v30, 2  ;;  %v2367_v53 = vsel %vm2338_vm13, 0, %v241_v47  ;;  %v336_v56 = vor.u32 4788187, %v335_v49  ;;  %v470_v0 = vand.u32 8388607, %v463_v34 }
  0x75   :  { %v2370_v61 = vand.u32 3, %v2367_v53  ;;  %v421_v62 = vadd.s32 536870912, %v420_v14  ;;  %v478_v1 = vsub.s32 32, %v477_v42  ;;  %v3025_v54 = vxor.u32 2147483648, %v2356_v48 }
  0x76   :  { %v3024_v15 = vxor.u32 2147483648, %v2349_v44  ;;  %1928 = vcosq.f32 %v242_v58  ;;  %v2379_v7 = vsel %vm259_vm15, %v343_v50, %v2260_v9  ;;  %v337_v8 = vand.u32 2147483647, %v336_v56 }
  0x77   :  { %v339_v11 = vcvt.s32.f32 %v332_v40  ;;  %v2381_v12 = vshrl.u32 %v421_v62, 30  ;;  %v476_v13 = vshrl.u32 %v475_v29, 5  ;;  %v480_v16 = vshll.u32 %v2050_v31, %v477_v42 }
  0x78   :  { %v481_v17 = vshrl.u32 %v2051_v33, %v478_v1  ;;  %v483_v28 = vshll.u32 %v2051_v33, %v477_v42  ;;  %v484_v23 = vshrl.u32 %v3029_v35, %v478_v1  ;;  %v486_v27 = vshll.u32 %v3029_v35, %v477_v42 }
  0x79   :  { %v423_v60 = vshll.u32 %v2381_v12, 30  ;;  %v487_v9 = vshrl.u32 %v3027_v37, %v478_v1  ;;  %v489_v21 = vshll.u32 %v3027_v37, %v477_v42  ;;  %1930 = vsinq.f32 %v242_v58 }
  0x7a   :  { %v471_v26 = vor.u32 8388608, %v470_v0  ;;  %v490_v2 = vshrl.u32 %v2054_v39, %v478_v1  ;;  %v569_v32 = vand.u32 2139095040, %v2247_v57  ;;  %vm145_vm3 = vcmp.lt.s32.totalorder %v2334_v30, 2 }
  0x7b   :  { %v340_v36 = vmul.f32 %v339_v11, %v337_v8  ;;  %v2394_v5 = vsub.s32 %v420_v14, %v423_v60  ;;  %v492_v20 = vshll.u32 %v2054_v39, %v477_v42  ;;  %v493_v38 = vshrl.u32 %v2055_v46, %v478_v1 }
  0x7c   :  { %v151_v41 = vsel %vm149_vm2, %v3024_v15, %v2356_v48  ;;  %v479_v43 = vshrl.u32 %v2050_v31, %v478_v1  ;;  %v482_v18 = vor.u32 %v481_v17, %v480_v16  ;;  %v485_v10 = vor.u32 %v484_v23, %v483_v28 }
  0x7d   :  { %vm2406_vm4 = vcmp.le.f32.partialorder %v257_v55, 0.7853982  ;;  %v426_v49 = vsub.s32 0, %v2394_v5  ;;  %v488_v50 = vor.u32 %v487_v9, %v486_v27  ;;  %v491_v51 = vor.u32 %v490_v2, %v489_v21 }
  0x7e   :  { %vm495_vm5 = vcmp.lt.s32.totalorder %v476_v13, 1  ;;  %v148_v29 = vsel %vm146_vm1, %v2349_v44, %v3025_v54  ;;  %v494_v58 = vor.u32 %v493_v38, %v492_v20  ;;  %vm498_vm6 = vcmp.lt.s32.totalorder %v476_v13, 4 }
  0x7f   :  { %v570_v40 = vshrl.u32 %v569_v32, 23  ;;  %vm143_vm7 = vweird.f32 %v2096_v3  ;;  %v341_v55 = vxor.u32 2147483648, %v340_v36  ;;  %v1830_v14 = vmin.u32 %v426_v49, %v2394_v5 }
  0x80   :  { %vm497_vm8 = vcmp.lt.s32.totalorder %v476_v13, 3  ;;  %v511_v42 = vshll.u32 %v471_v26, 8  ;;  %v2418_v56 = vpop.eup %1928  ;;  %vm496_vm9 = vcmp.lt.s32.totalorder %v476_v13, 2  ;;  %v499_v62 = vsel %vm495_vm5, %v479_v43, %v482_v18 }
  0x81   :  { %v500_v0 = vsel %vm498_vm6, %v488_v50, 2102212464  ;;  %v503_v1 = vsel %vm495_vm5, %v482_v18, %v485_v10  ;;  %vm252_vm10 = vcmp.eq.s32.totalorder %v2370_v61, 2  ;;  %v428_v8 = vclz %v1830_v14 }
  0x82   :  { %v501_v11 = vsel %vm497_vm8, %v485_v10, %v500_v0  ;;  %v504_v16 = vsel %vm498_vm6, %v491_v51, 920167782  ;;  %v507_v17 = vsel %vm495_vm5, %v485_v10, %v488_v50  ;;  %vm249_vm11 = vcmp.eq.s32.totalorder %v2370_v61, 0 }
  0x83   :  { %v416_v28 = vadd.s32 %v2324_v24, %v2319_v19  ;;  %v505_v23 = vsel %vm497_vm8, %v488_v50, %v504_v16  ;;  %v508_v60 = vsel %vm498_vm6, %v494_v58, 1326507024  ;;  %v1837_v27 = vadd.s32 4294967169, %v570_v40  ;;  %v2436_v32 = vpop.eup %1930 }
  0x84   :  { %v342_v9 = vsel %vm259_vm15, %v341_v55, %v340_v36  ;;  %v1831_v21 = vadd.s32 4294967294, %v428_v8  ;;  %v506_v26 = vsel %vm496_vm9, %v503_v1, %v505_v23  ;;  %v509_v2 = vsel %vm497_vm8, %v491_v51, %v508_v60 }
  0x85   :  { %v502_v20 = vsel %vm496_vm9, %v499_v62, %v501_v11  ;;  %v510_v38 = vsel %vm496_vm9, %v507_v17, %v509_v2  ;;  %v2440_v19 = vmul.u32.u64.low %v511_v42, %v506_v26  ;;  %v2441_v24 = vmul.u32.u64.high %v511_v42, %v506_v26, %v2440_v19 }
  0x86   :  { %vm1832_vm12 = vcmp.lt.s32.totalorder %v1831_v21, 0  ;;  %v2444_v43 = vmul.u32.u64.low %v511_v42, %v510_v38  ;;  %v2445_v18 = vmul.u32.u64.high %v511_v42, %v510_v38, %v2444_v43  ;;  %v576_v36 = vadd.s32 1, %v1837_v27 }
  0x87   :  { %v152_v10 = vsel %vm145_vm3, %v148_v29, %v151_v41  ;;  %vm248_vm13 = vcmp.lt.s32.totalorder %v2370_v61, 2  ;;  %v3020_v49 = vxor.u32 2147483648, %v2418_v56  ;;  %v431_v50 = vsel %vm1832_vm12, 0, %v1831_v21 }
  0x88   :  { %v566_v13 = vand.u32 2147483647, %v2247_v57  ;;  %v432_v51 = vsub.s32 32, %v431_v50  ;;  %v433_v58 = vshll.u32 %v2394_v5, %v431_v50  ;;  %v436_v40 = vsub.s32 4294967266, %v431_v50 }
  0x89   :  { %vm577_vm14 = vcmp.gt.s32.totalorder %v576_v36, 0  ;;  %v345_v55 = vsel %vm2406_vm4, %v2101_v6, %v342_v9  ;;  %v518_v14 = vmul.u32 %v511_v42, %v502_v20  ;;  %v521_v30 = vadd.s32 1, %v2441_v24 }
  0x8a   :  { %v578_v41 = vsel %vm577_vm14, %v576_v36, 0  ;;  %v3023_v29 = vxor.u32 2147483648, %v2436_v32  ;;  %v2461_v62 = vsel %vm2406_vm4, 0, %v2379_v7  ;;  %v434_v0 = vshrl.u32 %v416_v28, %v432_v51 }
  0x8b   :  { %v437_v1 = vadd.s32 127, %v436_v40  ;;  %v2465_v5 = vsel %vm143_vm7, nan, %v152_v10  ;;  %vm246_vm15 = vweird.f32 %v2098_v4  ;;  %v2469_v42 = vand.u32 3, %v2461_v62 }
  0x8c   :  { %vm362_vm0 = vcmp.lt.s32.totalorder %v2111_v22, 0  ;;  %vm520_vm1 = vc.u32 %v2445_v18, %v2440_v19  ;;  %v580_v8 = vand.u32 31, %v578_v41  ;;  %1932 = vcosq.f32 %v345_v55 }
  0x8d   :  { %v435_v7 = vor.u32 %v434_v0, %v433_v58  ;;  %v438_v47 = vshll.u32 %v437_v1, 23  ;;  %v522_v11 = vsel %vm520_vm1, %v521_v30, %v2441_v24  ;;  %v254_v16 = vsel %vm252_vm10, %v3020_v49, %v2436_v32 }
  0x8e   :  { %vm2482_vm2 = vcmp.le.f32.partialorder %v360_v45, 0.7853982  ;;  %v523_v28 = vadd.s32 %v522_v11, %v518_v14  ;;  %v573_v23 = vand.u32 8388607, %v566_v13  ;;  %v581_v60 = vsub.s32 32, %v580_v8 }
  0x8f   :  { %v251_v27 = vsel %vm249_vm11, %v2418_v56, %v3023_v29  ;;  %1934 = vsinq.f32 %v345_v55  ;;  %v439_v9 = vor.u32 4788187, %v438_v47  ;;  %v442_v21 = vcvt.s32.f32 %v435_v7 }
  0x90   :  { %v524_v26 = vadd.s32 536870912, %v523_v28  ;;  %v2493_v2 = vshrl.u32 %v578_v41, 5  ;;  %v583_v45 = vshll.u32 %v2050_v31, %v580_v8  ;;  %v586_v20 = vshll.u32 %v2051_v33, %v580_v8 }
  0x91   :  { %v440_v38 = vand.u32 2147483647, %v439_v9  ;;  %v584_v24 = vshrl.u32 %v2051_v33, %v581_v60  ;;  %v587_v43 = vshrl.u32 %v3029_v35, %v581_v60  ;;  %v589_v36 = vshll.u32 %v3029_v35, %v580_v8 }
  0x92   :  { %v2500_v10 = vshrl.u32 %v524_v26, 30  ;;  %v590_v50 = vshrl.u32 %v3027_v37, %v581_v60  ;;  %v592_v51 = vshll.u32 %v3027_v37, %v580_v8  ;;  %v593_v58 = vshrl.u32 %v2054_v39, %v581_v60 }
  0x93   :  { %v255_v40 = vsel %vm248_vm13, %v251_v27, %v254_v16  ;;  %v443_v55 = vmul.f32 %v442_v21, %v440_v38  ;;  %v446_v14 = vsub.s32 4, %v2381_v12  ;;  %v595_v30 = vshll.u32 %v2054_v39, %v580_v8 }
  0x94   :  { %v526_v41 = vshll.u32 %v2500_v10, 30  ;;  %v574_v0 = vor.u32 8388608, %v573_v23  ;;  %v582_v1 = vshrl.u32 %v2050_v31, %v581_v60  ;;  %v596_v7 = vshrl.u32 %v2055_v46, %v581_v60 }
  0x95   :  { %v444_v47 = vxor.u32 2147483648, %v443_v55  ;;  %v585_v11 = vor.u32 %v584_v24, %v583_v45  ;;  %v588_v9 = vor.u32 %v587_v43, %v586_v20  ;;  %v594_v26 = vor.u32 %v593_v58, %v592_v51 }
  0x96   :  { %v2512_v49 = vsub.s32 %v523_v28, %v526_v41  ;;  %v591_v61 = vor.u32 %v590_v50, %v589_v36  ;;  %vm598_vm3 = vcmp.lt.s32.totalorder %v2493_v2, 1  ;;  %vm601_vm4 = vcmp.lt.s32.totalorder %v2493_v2, 4  ;;  %v2516_v16 = vpop.eup %1932 }
  0x97   :  { %v2520_v8 = vsel %vm246_vm15, nan, %v255_v40  ;;  %vm355_vm5 = vcmp.eq.s32.totalorder %v2469_v42, 2  ;;  %v445_v23 = vsel %vm362_vm0, %v444_v47, %v443_v55  ;;  %v447_v28 = vsel %vm362_vm0, %v446_v14, %v2381_v12 }
  0x98   :  { %v597_v60 = vor.u32 %v596_v7, %v595_v30  ;;  %vm352_vm6 = vcmp.eq.s32.totalorder %v2469_v42, 0  ;;  %v529_v27 = vsub.s32 0, %v2512_v49  ;;  %vm600_vm8 = vcmp.lt.s32.totalorder %v2493_v2, 3 }
  0x99   :  { %v603_v21 = vsel %vm601_vm4, %v591_v61, 2102212464  ;;  %v614_v45 = vshll.u32 %v574_v0, 8  ;;  %v2533_v20 = vpop.eup %1934  ;;  %v448_v38 = vsel %vm2482_vm2, %v2111_v22, %v445_v23  ;;  %vm599_vm9 = vcmp.lt.s32.totalorder %v2493_v2, 2 }
  0x9a   :  { %v606_v12 = vsel %vm598_vm3, %v585_v11, %v588_v9  ;;  %v607_v24 = vsel %vm601_vm4, %v594_v26, 920167782  ;;  %v3021_v43 = vxor.u32 2147483648, %v2516_v16  ;;  %v2546_v36 = vsel %vm2482_vm2, 0, %v447_v28 }
  0x9b   :  { %vm465_vm10 = vcmp.lt.s32.totalorder %v2243_v52, 0  ;;  %v1834_v50 = vmin.u32 %v529_v27, %v2512_v49  ;;  %v602_v51 = vsel %vm598_vm3, %v582_v1, %v585_v11  ;;  %v604_v58 = vsel %vm600_vm8, %v588_v9, %v603_v21 }
  0x9c   :  { %v608_v40 = vsel %vm600_vm8, %v591_v61, %v607_v24  ;;  %v610_v55 = vsel %vm598_vm3, %v588_v9, %v591_v61  ;;  %v611_v17 = vsel %vm601_vm4, %v597_v60, 1326507024  ;;  %vm351_vm11 = vcmp.lt.s32.totalorder %v2469_v42, 2 }
  0x9d   :  { %1936 = vcosq.f32 %v448_v38  ;;  %v531_v14 = vclz %v1834_v50  ;;  %v609_v30 = vsel %vm599_vm9, %v606_v12, %v608_v40  ;;  %v612_v41 = vsel %vm600_vm8, %v594_v26, %v611_v17 }
  0x9e   :  { %vm2567_vm12 = vcmp.le.f32.partialorder %v463_v34, 0.7853982  ;;  %v613_v1 = vsel %vm599_vm9, %v610_v55, %v612_v41  ;;  %v2573_v7 = vmul.u32.u64.low %v614_v45, %v609_v30  ;;  %v2574_v47 = vmul.u32.u64.high %v614_v45, %v609_v30, %v2573_v7 }
  0x9f   :  { %v672_v11 = vand.u32 2139095040, %v2249_v59  ;;  %v1835_v9 = vadd.s32 4294967294, %v531_v14  ;;  %v605_v61 = vsel %vm599_vm9, %v602_v51, %v604_v58  ;;  %v3022_v34 = vxor.u32 2147483648, %v2533_v20 }
  0xa0   :  { %v2579_v23 = vmul.u32.u64.low %v614_v45, %v613_v1  ;;  %v2580_v26 = vmul.u32.u64.high %v614_v45, %v613_v1, %v2579_v23  ;;  %v2584_v28 = vand.u32 3, %v2546_v36  ;;  %v549_v60 = vsub.s32 4, %v2500_v10 }
  0xa1   :  { %v673_v27 = vshrl.u32 %v672_v11, 23  ;;  %1938 = vsinq.f32 %v448_v38  ;;  %v519_v21 = vadd.s32 %v2440_v19, %v2445_v18  ;;  %vm1836_vm13 = vcmp.lt.s32.totalorder %v1835_v9, 0 }
  0xa2   :  { %v3026_v12 = vand.u32 2147483647, %v2249_v59  ;;  %v534_v2 = vsel %vm1836_vm13, 0, %v1835_v9  ;;  %v621_v24 = vmul.u32 %v614_v45, %v605_v61  ;;  %v624_v50 = vadd.s32 1, %v2574_v47 }
  0xa3   :  { %v1841_v51 = vadd.s32 4294967169, %v673_v27  ;;  %v357_v58 = vsel %vm355_vm5, %v3021_v43, %v2533_v20  ;;  %v535_v40 = vsub.s32 32, %v534_v2  ;;  %v536_v38 = vshll.u32 %v2512_v49, %v534_v2 }
  0xa4   :  { %v539_v55 = vsub.s32 4294967266, %v534_v2  ;;  %v354_v19 = vsel %vm352_vm6, %v2516_v16, %v3022_v34  ;;  %v550_v18 = vsel %vm465_vm10, %v549_v60, %v2500_v10  ;;  %vm623_vm14 = vc.u32 %v2580_v26, %v2573_v7 }
  0xa5   :  { %v679_v45 = vadd.s32 1, %v1841_v51  ;;  %v537_v17 = vshrl.u32 %v519_v21, %v535_v40  ;;  %v625_v30 = vsel %vm623_vm14, %v624_v50, %v2574_v47  ;;  %v676_v49 = vand.u32 8388607, %v3026_v12 }
  0xa6   :  { %v540_v14 = vadd.s32 127, %v539_v55  ;;  %vm458_vm0 = vcmp.eq.s32.totalorder %v2584_v28, 2  ;;  %v626_v41 = vadd.s32 %v625_v30, %v621_v24  ;;  %v775_v1 = vand.u32 2139095040, %v2299_v63 }
  0xa7   :  { %vm680_vm1 = vcmp.gt.s32.totalorder %v679_v45, 0  ;;  %v2611_v11 = vpop.eup %1936  ;;  %vm455_vm2 = vcmp.eq.s32.totalorder %v2584_v28, 0  ;;  %v538_v10 = vor.u32 %v537_v17, %v536_v38  ;;  %v2616_v61 = vsel %vm2567_vm12, 0, %v550_v18 }
  0xa8   :  { %v541_v9 = vshll.u32 %v540_v14, 23  ;;  %v681_v47 = vsel %vm680_vm1, %v679_v45, 0  ;;  %v2620_v23 = vsel %vm351_vm11, %v354_v19, %v357_v58  ;;  %v2623_v60 = vand.u32 3, %v2616_v61 }
  0xa9   :  { %v627_v27 = vadd.s32 536870912, %v626_v41  ;;  %v683_v21 = vand.u32 31, %v681_v47  ;;  %v545_v24 = vcvt.s32.f32 %v538_v10  ;;  %v677_v50 = vor.u32 8388608, %v676_v49 }
  0xaa   :  { %v542_v2 = vor.u32 4788187, %v541_v9  ;;  %v3031_v51 = vand.u32 2147483647, %v2299_v63  ;;  %v2627_v40 = vadd.s32 %v2573_v7, %v2580_v26  ;;  %v776_v18 = vshrl.u32 %v775_v1, 23 }
  0xab   :  { %v2629_v38 = vshrl.u32 %v627_v27, 30  ;;  %v684_v55 = vsub.s32 32, %v683_v21  ;;  %v2631_v42 = vpop.eup %1938  ;;  %v3032_v58 = vxor.u32 2147483648, %v2611_v11  ;;  %v686_v45 = vshll.u32 %v2050_v31, %v683_v21 }
  0xac   :  { %v543_v19 = vand.u32 2147483647, %v542_v2  ;;  %v689_v17 = vshll.u32 %v2051_v33, %v683_v21  ;;  %v692_v7 = vshll.u32 %v3029_v35, %v683_v21  ;;  %v695_v26 = vshll.u32 %v3027_v37, %v683_v21 }
  0xad   :  { %v629_v14 = vshll.u32 %v2629_v38, 30  ;;  %v687_v30 = vshrl.u32 %v2051_v33, %v684_v55  ;;  %v690_v1 = vshrl.u32 %v3029_v35, %v684_v55  ;;  %v693_v10 = vshrl.u32 %v3027_v37, %v684_v55 }
  0xae   :  { %v546_v49 = vmul.f32 %v545_v24, %v543_v19  ;;  %v696_v9 = vshrl.u32 %v2054_v39, %v684_v55  ;;  %v456_v27 = vxor.u32 2147483648, %v2631_v42  ;;  %v682_v43 = vshrl.u32 %v681_v47, 5 }
  0xaf   :  { %v2644_v2 = vsub.s32 %v626_v41, %v629_v14  ;;  %v2646_v34 = vshll.u32 %v677_v50, 8  ;;  %v460_v29 = vsel %vm458_vm0, %v3032_v58, %v2631_v42  ;;  %v698_v19 = vshll.u32 %v2054_v39, %v683_v21 }
  0xb0   :  { %v547_v24 = vxor.u32 2147483648, %v546_v49  ;;  %v1845_v15 = vadd.s32 4294967169, %v776_v18  ;;  %vm349_vm3 = vweird.f32 %v2101_v6  ;;  %v685_v41 = vshrl.u32 %v2050_v31, %v684_v55 }
  0xb1   :  { %v632_v54 = vsub.s32 0, %v2644_v2  ;;  %v688_v14 = vor.u32 %v687_v30, %v686_v45  ;;  %v699_v47 = vshrl.u32 %v2055_v46, %v684_v55  ;;  %v691_v12 = vor.u32 %v690_v1, %v689_v17 }
  0xb2   :  { %v548_v50 = vsel %vm465_vm10, %v547_v24, %v546_v49  ;;  %v694_v37 = vor.u32 %v693_v10, %v692_v7  ;;  %v697_v35 = vor.u32 %v696_v9, %v695_v26  ;;  %vm454_vm4 = vcmp.lt.s32.totalorder %v2584_v28, 2 }
  0xb3   :  { %v457_v21 = vsel %vm455_vm2, %v2611_v11, %v456_v27  ;;  %v551_v18 = vsel %vm2567_vm12, %v2243_v52, %v548_v50  ;;  %vm568_vm5 = vcmp.lt.s32.totalorder %v2247_v57, 0  ;;  %v1838_v55 = vmin.u32 %v632_v54, %v2644_v2 }
  0xb4   :  { %vm701_vm6 = vcmp.lt.s32.totalorder %v682_v43, 1  ;;  %v700_v45 = vor.u32 %v699_v47, %v698_v19  ;;  %vm702_vm8 = vcmp.lt.s32.totalorder %v682_v43, 2  ;;  %vm703_vm9 = vcmp.lt.s32.totalorder %v682_v43, 3 }
  0xb5   :  { %vm704_vm10 = vcmp.lt.s32.totalorder %v682_v43, 4  ;;  %1940 = vcosq.f32 %v551_v18  ;;  %v634_v17 = vclz %v1838_v55  ;;  %v705_v30 = vsel %vm701_vm6, %v685_v41, %v688_v14 }
  0xb6   :  { %v706_v7 = vsel %vm704_vm10, %v694_v37, 2102212464  ;;  %vm452_vm11 = vweird.f32 %v2111_v22  ;;  %v709_v49 = vsel %vm701_vm6, %v688_v14, %v691_v12  ;;  %v710_v0 = vsel %vm704_vm10, %v697_v35, 920167782 }
  0xb7   :  { %v707_v26 = vsel %vm703_vm9, %v691_v12, %v706_v7  ;;  %v713_v1 = vsel %vm701_vm6, %v691_v12, %v694_v37  ;;  %1942 = vsinq.f32 %v551_v18  ;;  %vm2675_vm12 = vcmp.le.f32.partialorder %v566_v13, 0.7853982 }
  0xb8   :  { %v1839_v10 = vadd.s32 4294967294, %v634_v17  ;;  %v711_v9 = vsel %vm703_vm9, %v694_v37, %v710_v0  ;;  %v714_v24 = vsel %vm704_vm10, %v700_v45, 1326507024  ;;  %v652_v19 = vsub.s32 4, %v2629_v38 }
  0xb9   :  { %v708_v41 = vsel %vm702_vm8, %v705_v30, %v707_v26  ;;  %v712_v47 = vsel %vm702_vm8, %v709_v49, %v711_v9  ;;  %v715_v14 = vsel %vm703_vm9, %v697_v35, %v714_v24  ;;  %v782_v45 = vadd.s32 1, %v1845_v15 }
  0xba   :  { %vm1840_vm13 = vcmp.lt.s32.totalorder %v1839_v10, 0  ;;  %v716_v12 = vsel %vm702_vm8, %v713_v1, %v715_v14  ;;  %v2686_v13 = vmul.u32.u64.low %v2646_v34, %v712_v47  ;;  %v2687_v50 = vmul.u32.u64.high %v2646_v34, %v712_v47, %v2686_v13 }
  0xbb   :  { %v637_v18 = vsel %vm1840_vm13, 0, %v1839_v10  ;;  %v2691_v37 = vmul.u32.u64.low %v2646_v34, %v716_v12  ;;  %v2692_v55 = vmul.u32.u64.high %v2646_v34, %v716_v12, %v2691_v37  ;;  %v779_v35 = vand.u32 8388607, %v3031_v51 }
  0xbc   :  { %v638_v17 = vsub.s32 32, %v637_v18  ;;  %v639_v30 = vshll.u32 %v2644_v2, %v637_v18  ;;  %v642_v7 = vsub.s32 4294967266, %v637_v18  ;;  %v2700_v43 = vsel %vm349_vm3, nan, %v2620_v23 }
  0xbd   :  { %v653_v26 = vsel %vm568_vm5, %v652_v19, %v2629_v38  ;;  %v724_v49 = vmul.u32 %v2646_v34, %v708_v41  ;;  %vm783_vm14 = vcmp.gt.s32.totalorder %v782_v45, 0  ;;  %v727_v2 = vadd.s32 1, %v2687_v50 }
  0xbe   :  { %v640_v15 = vshrl.u32 %v2627_v40, %v638_v17  ;;  %v643_v0 = vadd.s32 127, %v642_v7  ;;  %v784_v1 = vsel %vm783_vm14, %v782_v45, 0  ;;  %v461_v10 = vsel %vm454_vm4, %v457_v21, %v460_v29 }
  0xbf   :  { %vm558_vm0 = vcmp.eq.s32.totalorder %v2623_v60, 0  ;;  %vm726_vm1 = vc.u32 %v2692_v55, %v2686_v13  ;;  %v786_v23 = vand.u32 31, %v784_v1  ;;  %v2713_v9 = vpop.eup %1940  ;;  %v780_v40 = vor.u32 8388608, %v779_v35 }
  0xc0   :  { %v641_v38 = vor.u32 %v640_v15, %v639_v30  ;;  %v644_v34 = vshll.u32 %v643_v0, 23  ;;  %v728_v24 = vsel %vm726_vm1, %v727_v2, %v2687_v50  ;;  %vm561_vm2 = vcmp.eq.s32.totalorder %v2623_v60, 2 }
  0xc1   :  { %v2719_v19 = vsel %vm2675_vm12, 0, %v653_v26  ;;  %v729_v29 = vadd.s32 %v728_v24, %v724_v49  ;;  %v787_v28 = vsub.s32 32, %v786_v23  ;;  %v2721_v21 = vpop.eup %1942  ;;  %v2725_v41 = vsel %vm452_vm11, nan, %v461_v10 }
  0xc2   :  { %v645_v47 = vor.u32 4788187, %v644_v34  ;;  %v648_v14 = vcvt.s32.f32 %v641_v38  ;;  %v2728_v12 = vand.u32 3, %v2719_v19  ;;  %v3033_v50 = vxor.u32 2147483648, %v2713_v9 }
  0xc3   :  { %v730_v18 = vadd.s32 536870912, %v729_v29  ;;  %v789_v37 = vshll.u32 %v2050_v31, %v786_v23  ;;  %v790_v45 = vshrl.u32 %v2051_v33, %v787_v28  ;;  %vm557_vm4 = vcmp.lt.s32.totalorder %v2623_v60, 2 }
  0xc4   :  { %v646_v17 = vand.u32 2147483647, %v645_v47  ;;  %v792_v30 = vshll.u32 %v2051_v33, %v786_v23  ;;  %v3047_v7 = vmov 2131351028   ;;  %v2736_v26 = vshll.u32 %v780_v40, 8 }
  0xc5   :  { %v793_v35 = vshrl.u32 %v3047_v7, %v787_v28  ;;  %v559_v49 = vxor.u32 2147483648, %v2721_v21  ;;  %v2739_v15 = vshrl.u32 %v730_v18, 30  ;;  %v785_v0 = vshrl.u32 %v784_v1, 5 }
  0xc6   :  { %v795_v2 = vshll.u32 %v3047_v7, %v786_v23  ;;  %v649_v10 = vmul.f32 %v648_v14, %v646_v17  ;;  %v3048_v38 = vmov 2102212464   ;;  %v799_v47 = vshrl.u32 %v2054_v39, %v787_v28 }
  0xc7   :  { %v796_v34 = vshrl.u32 %v3048_v38, %v787_v28  ;;  %v798_v24 = vshll.u32 %v3048_v38, %v786_v23  ;;  %v563_v33 = vsel %vm561_vm2, %v3033_v50, %v2721_v21  ;;  %v732_v40 = vshll.u32 %v2739_v15, 30 }
  0xc8   :  { %v791_v18 = vor.u32 %v790_v45, %v789_v37  ;;  %v801_v1 = vshll.u32 %v2054_v39, %v786_v23  ;;  %vm3034_vm6 = vweird.f32 %v2243_v52  ;;  %v650_v14 = vxor.u32 2147483648, %v649_v10 }
  0xc9   :  { %v794_v17 = vor.u32 %v793_v35, %v792_v30  ;;  %v800_v7 = vor.u32 %v799_v47, %v798_v24  ;;  %v802_v38 = vshrl.u32 %v2055_v46, %v787_v28  ;;  %v560_v51 = vsel %vm558_vm0, %v2713_v9, %v559_v49 }
  0xca   :  { %v2759_v58 = vsub.s32 %v729_v29, %v732_v40  ;;  %v788_v50 = vshrl.u32 %v2050_v31, %v787_v28  ;;  %vm804_vm8 = vcmp.lt.s32.totalorder %v785_v0, 1  ;;  %v651_v39 = vsel %vm568_vm5, %v650_v14, %v649_v10 }
  0xcb   :  { %v797_v23 = vor.u32 %v796_v34, %v795_v2  ;;  %vm805_vm9 = vcmp.lt.s32.totalorder %v785_v0, 2  ;;  %vm807_vm10 = vcmp.lt.s32.totalorder %v785_v0, 4  ;;  %v654_v46 = vsel %vm2675_vm12, %v2247_v57, %v651_v39 }
  0xcc   :  { %v735_v37 = vsub.s32 0, %v2759_v58  ;;  %v803_v45 = vor.u32 %v802_v38, %v801_v1  ;;  %vm806_vm13 = vcmp.lt.s32.totalorder %v785_v0, 3  ;;  %1944 = vcosq.f32 %v654_v46 }
  0xcd   :  { %v809_v29 = vsel %vm807_vm10, %v797_v23, 2102212464  ;;  %v812_v31 = vsel %vm804_vm8, %v791_v18, %v794_v17  ;;  %v813_v28 = vsel %vm807_vm10, %v800_v7, 920167782  ;;  %1946 = vsinq.f32 %v654_v46 }
  0xce   :  { %v1842_v30 = vmin.u32 %v735_v37, %v2759_v58  ;;  %v808_v35 = vsel %vm804_vm8, %v788_v50, %v791_v18  ;;  %v968_v2 = vadd.s32 3, %v2330_v25  ;;  %v810_v54 = vsel %vm806_vm13, %v794_v17, %v809_v29 }
  0xcf   :  { %v814_v10 = vsel %vm806_vm13, %v797_v23, %v813_v28  ;;  %v816_v34 = vsel %vm804_vm8, %v794_v17, %v797_v23  ;;  %v1072_v24 = vadd.s32 3, %v2367_v53  ;;  %v564_v47 = vsel %vm557_vm4, %v560_v51, %v563_v33 }
  0xd0   :  { %v737_v40 = vclz %v1842_v30  ;;  %v815_v1 = vsel %vm805_vm9, %v812_v31, %v814_v10  ;;  %v817_v14 = vsel %vm807_vm10, %v803_v45, 1326507024  ;;  %v811_v50 = vsel %vm805_vm9, %v808_v35, %v810_v54 }
  0xd1   :  { %v818_v25 = vsel %vm806_vm13, %v800_v7, %v817_v14  ;;  %v2785_v18 = vmul.u32.u64.low %v2736_v26, %v815_v1  ;;  %v2786_v38 = vmul.u32.u64.high %v2736_v26, %v815_v1, %v2785_v18  ;;  %vm661_vm5 = vcmp.eq.s32.totalorder %v2728_v12, 0 }
  0xd2   :  { %vm671_vm12 = vcmp.lt.s32.totalorder %v2249_v59, 0  ;;  %v1843_v53 = vadd.s32 4294967294, %v737_v40  ;;  %v819_v60 = vsel %vm805_vm9, %v816_v34, %v818_v25  ;;  %v969_v51 = vand.u32 3, %v968_v2 }
  0xd3   :  { %vm660_vm14 = vcmp.lt.s32.totalorder %v2728_v12, 2  ;;  %vm664_vm0 = vcmp.eq.s32.totalorder %v2728_v12, 2  ;;  %v2794_v33 = vmul.u32.u64.low %v2736_v26, %v819_v60  ;;  %v2795_v17 = vmul.u32.u64.high %v2736_v26, %v819_v60, %v2794_v33 }
  0xd4   :  { %v1176_v7 = vadd.s32 3, %v2461_v62  ;;  %v2800_v39 = vsel %vm3034_vm6, nan, %v564_v47  ;;  %v725_v23 = vadd.s32 %v2686_v13, %v2692_v55  ;;  %vm1844_vm1 = vcmp.lt.s32.totalorder %v1843_v53, 0 }
  0xd5   :  { %v827_v0 = vmul.u32 %v2736_v26, %v811_v50  ;;  %v3049_v46 = vand.u32 2147483647, %v2249_v59  ;;  %v740_v45 = vsel %vm1844_vm1, 0, %v1843_v53  ;;  %v830_v29 = vadd.s32 1, %v2786_v38 }
  0xd6   :  { %vm971_vm4 = vcmp.eq.s32.totalorder %v969_v51, 0  ;;  %v1073_v62 = vand.u32 3, %v1072_v24  ;;  %vm658_vm8 = vweird.f32 %v2247_v57  ;;  %v741_v31 = vsub.s32 32, %v740_v45  ;;  %v2814_v55 = vpop.eup %1944 }
  0xd7   :  { %vm2807_vm2 = vcmp.le.f32.partialorder %v3049_v46, 0.7853982  ;;  %v742_v28 = vshll.u32 %v2759_v58, %v740_v45  ;;  %v745_v13 = vsub.s32 4294967266, %v740_v45  ;;  %vm974_vm9 = vcmp.eq.s32.totalorder %v969_v51, 2  ;;  %v2819_v35 = vpop.eup %1946 }
  0xd8   :  { %v755_v26 = vsub.s32 4, %v2739_v15  ;;  %vm829_vm10 = vc.u32 %v2795_v17, %v2785_v18  ;;  %vm970_vm13 = vcmp.lt.s32.totalorder %v969_v51, 2  ;;  %v1280_v30 = vadd.s32 3, %v2546_v36 }
  0xd9   :  { %v665_v2 = vxor.u32 2147483648, %v2814_v55  ;;  %v743_v54 = vshrl.u32 %v725_v23, %v741_v31  ;;  %v746_v10 = vadd.s32 127, %v745_v13  ;;  %v831_v34 = vsel %vm829_vm10, %v830_v29, %v2786_v38 }
  0xda   :  { %v662_v58 = vxor.u32 2147483648, %v2819_v35  ;;  %v832_v24 = vadd.s32 %v831_v34, %v827_v0  ;;  %v3052_v47 = vxor.u32 2147483648, %v2356_v48  ;;  %v3053_v1 = vxor.u32 2147483648, %v2349_v44 }
  0xdb   :  { %v744_v14 = vor.u32 %v743_v54, %v742_v28  ;;  %v747_v50 = vshll.u32 %v746_v10, 23  ;;  %vm1075_vm1 = vcmp.eq.s32.totalorder %v1073_v62, 0  ;;  %vm1078_vm6 = vcmp.eq.s32.totalorder %v1073_v62, 2 }
  0xdc   :  { %v973_v40 = vsel %vm971_vm4, %v2349_v44, %v3052_v47  ;;  %v976_v36 = vsel %vm974_vm9, %v3053_v1, %v2356_v48  ;;  %v663_v25 = vsel %vm661_vm5, %v2814_v55, %v662_v58  ;;  %v666_v38 = vsel %vm664_vm0, %v665_v2, %v2819_v35 }
  0xdd   :  { %v756_v44 = vsel %vm671_vm12, %v755_v26, %v2739_v15  ;;  %v833_v48 = vadd.s32 536870912, %v832_v24  ;;  %v748_v53 = vor.u32 4788187, %v747_v50  ;;  %v751_v60 = vcvt.s32.f32 %v744_v14 }
  0xde   :  { %v977_v33 = vsel %vm970_vm13, %v973_v40, %v976_v36  ;;  %v1177_v23 = vand.u32 3, %v1176_v7  ;;  %vm1074_vm4 = vcmp.lt.s32.totalorder %v1073_v62, 2  ;;  %v3054_v46 = vxor.u32 2147483648, %v2436_v32 }
  0xdf   :  { %v2845_v0 = vshrl.u32 %v833_v48, 30  ;;  %v3055_v29 = vxor.u32 2147483648, %v2418_v56  ;;  %v667_v15 = vsel %vm660_vm14, %v663_v25, %v666_v38  ;;  %v749_v28 = vand.u32 2147483647, %v748_v53 }
  0xe0   :  { %v1077_v45 = vsel %vm1075_vm1, %v2418_v56, %v3054_v46  ;;  %v758_v51 = vsel %vm2807_vm2, 0, %v756_v44  ;;  %v1281_v13 = vand.u32 3, %v1280_v30  ;;  %v2860_v62 = vadd.s32 %v2785_v18, %v2795_v17 }
  0xe1   :  { %v1080_v31 = vsel %vm1078_vm6, %v3055_v29, %v2436_v32  ;;  %v2857_v7 = vand.u32 3, %v758_v51  ;;  %v835_v26 = vshll.u32 %v2845_v0, 30  ;;  %v1384_v54 = vadd.s32 3, %v2616_v61 }
  0xe2   :  { %v752_v10 = vmul.f32 %v751_v60, %v749_v28  ;;  %v2866_v56 = vsel %vm143_vm7, nan, %v977_v33  ;;  %v1081_v32 = vsel %vm1074_vm4, %v1077_v45, %v1080_v31  ;;  %vm1179_vm6 = vcmp.eq.s32.totalorder %v1177_v23, 0 }
  0xe3   :  { %v2870_v12 = vsel %vm658_vm8, nan, %v667_v15  ;;  %v2872_v30 = vsub.s32 %v832_v24, %v835_v26  ;;  %vm1178_vm5 = vcmp.lt.s32.totalorder %v1177_v23, 2  ;;  %vm1182_vm14 = vcmp.eq.s32.totalorder %v1177_v23, 2 }
  0xe4   :  { %v753_v18 = vxor.u32 2147483648, %v752_v10  ;;  %vm774_vm0 = vcmp.lt.s32.totalorder %v2299_v63, 0  ;;  %vm1283_vm9 = vcmp.eq.s32.totalorder %v1281_v13, 0  ;;  %vm1286_vm10 = vcmp.eq.s32.totalorder %v1281_v13, 2 }
  0xe5   :  { %v1385_v61 = vand.u32 3, %v1384_v54  ;;  %v838_v3 = vsub.s32 0, %v2872_v30  ;;  %v2880_v17 = vsel %vm246_vm15, nan, %v1081_v32  ;;  %v3056_v34 = vxor.u32 2147483648, %v2533_v20 }
  0xe6   :  { %v1488_v47 = vadd.s32 3, %v2719_v19  ;;  %v754_v40 = vsel %vm671_vm12, %v753_v18, %v752_v10  ;;  %v3057_v1 = vxor.u32 2147483648, %v2516_v16  ;;  %vm1282_vm7 = vcmp.lt.s32.totalorder %v1281_v13, 2 }
  0xe7   :  { %v1181_v24 = vsel %vm1179_vm6, %v2516_v16, %v3056_v34  ;;  %vm1387_vm13 = vcmp.eq.s32.totalorder %v1385_v61, 0  ;;  %v757_v4 = vsel %vm2807_vm2, %v2249_v59, %v754_v40  ;;  %v1846_v14 = vmin.u32 %v838_v3, %v2872_v30 }
  0xe8   :  { %v1184_v36 = vsel %vm1182_vm14, %v3057_v1, %v2533_v20  ;;  %v1285_v50 = vsel %vm1283_vm9, %v2611_v11, %v456_v27  ;;  %v3058_v19 = vxor.u32 2147483648, %v2611_v11  ;;  %1948 = vcosq.f32 %v757_v4 }
  0xe9   :  { %v858_v16 = vsub.s32 4, %v2845_v0  ;;  %vm1386_vm15 = vcmp.lt.s32.totalorder %v1385_v61, 2  ;;  %v1389_v20 = vsel %vm1387_vm13, %v2713_v9, %v559_v49  ;;  %1950 = vsinq.f32 %v757_v4 }
  0xea   :  { %v1288_v25 = vsel %vm1286_vm10, %v3058_v19, %v2631_v42  ;;  %v840_v37 = vclz %v1846_v14  ;;  %vm1390_vm12 = vcmp.eq.s32.totalorder %v1385_v61, 2  ;;  %v1489_v38 = vand.u32 3, %v1488_v47 }
  0xeb   :  { %vm767_vm2 = vcmp.eq.s32.totalorder %v2857_v7, 2  ;;  %v1185_v27 = vsel %vm1178_vm5, %v1181_v24, %v1184_v36  ;;  %v1289_v11 = vsel %vm1282_vm7, %v1285_v50, %v1288_v25  ;;  %v3059_v42 = vxor.u32 2147483648, %v2713_v9 }
  0xec   :  { %v1592_v48 = vadd.s32 3, %v758_v51  ;;  %vm764_vm1 = vcmp.eq.s32.totalorder %v2857_v7, 0  ;;  %v1847_v49 = vadd.s32 4294967294, %v840_v37  ;;  %vm1490_vm4 = vcmp.lt.s32.totalorder %v1489_v38, 2 }
  0xed   :  { %v1392_v44 = vsel %vm1390_vm12, %v3059_v42, %v2721_v21  ;;  %vm1491_vm6 = vcmp.eq.s32.totalorder %v1489_v38, 0  ;;  %vm763_vm14 = vcmp.lt.s32.totalorder %v2857_v7, 2  ;;  %vm1494_vm5 = vcmp.eq.s32.totalorder %v1489_v38, 2 }
  0xee   :  { %v1393_v53 = vsel %vm1386_vm15, %v1389_v20, %v1392_v44  ;;  %v1493_v60 = vsel %vm1491_vm6, %v2814_v55, %v662_v58  ;;  %v1593_v33 = vand.u32 3, %v1592_v48  ;;  %v2919_v23 = vstv %s2875_s1 }
  0xef   :  { %vm761_vm9 = vweird.f32 %v2249_v59  ;;  %vm1848_vm10 = vcmp.lt.s32.totalorder %v1847_v49, 0  ;;  %v859_v9 = vsel %vm774_vm0, %v858_v16, %v2845_v0  ;;  %v1186_v21 = vsel %vm349_vm3, nan, %v1185_v27 }
  0xf0   :  { %v1496_v46 = vsel %vm1494_vm5, %v665_v2, %v2819_v35  ;;  %v843_v45 = vsel %vm1848_vm10, 0, %v1847_v49  ;;  %v1290_v58 = vsel %vm452_vm11, nan, %v1289_v11  ;;  %vm3060_vm7 = vweird.f32 %v2243_v52 }
  0xf1   :  { %v1394_v29 = vsel %vm3060_vm7, nan, %v1393_v53  ;;  %v1497_v31 = vsel %vm1490_vm4, %v1493_v60, %v1496_v46  ;;  %v844_v15 = vsub.s32 32, %v843_v45  ;;  %v845_v28 = vshll.u32 %v2872_v30, %v843_v45 }
  0xf2   :  { %v848_v0 = vsub.s32 4294967266, %v843_v45  ;;  %v1709_v6 = vmul.f32 %v2919_v23, %v2465_v5  ;;  %v1498_v55 = vsel %vm658_vm8, nan, %v1497_v31  ;;  %vm1594_vm3 = vcmp.lt.s32.totalorder %v1593_v33, 2  ;;  %v1949_v57 = vpop.eup %1948 }
  0xf3   :  { %vm1595_vm13 = vcmp.eq.s32.totalorder %v1593_v33, 0  ;;  %vm1598_vm15 = vcmp.eq.s32.totalorder %v1593_v33, 2  ;;  %v3061_v22 = vand.u32 2147483647, %v2299_v63  ;;  %v846_v35 = vshrl.u32 %v2860_v62, %v844_v15  ;;  %v1951_v62 = vpop.eup %1950 }
  0xf4   :  { %v849_v2 = vadd.s32 127, %v848_v0  ;;  %v1710_v51 = vmul.f32 %v2919_v23, %v2520_v8  ;;  %v1711_v5 = vmul.f32 %v2919_v23, %v2700_v43  ;;  %v1712_v13 = vmul.f32 %v2919_v23, %v2725_v41 }
  0xf5   :  { %vm2941_vm11 = vcmp.le.f32.partialorder %v3061_v22, 0.7853982  ;;  %v1713_v26 = vmul.f32 %v2919_v23, %v2800_v39  ;;  %v1714_v54 = vmul.f32 %v2919_v23, %v2870_v12  ;;  %v2957_v10 = vstv %s2911_s30 }
  0xf6   :  { %v768_v32 = vxor.u32 2147483648, %v1949_v57  ;;  %v847_v8 = vor.u32 %v846_v35, %v845_v28  ;;  %v850_v30 = vshll.u32 %v849_v2, 23  ;;  %v1719_v43 = vmul.f32 %v2957_v10, %v2866_v56 }
  0xf7   :  { %v765_v18 = vxor.u32 2147483648, %v1951_v62  ;;  %v1720_v41 = vmul.f32 %v2957_v10, %v2880_v17  ;;  %v1721_v39 = vmul.f32 %v2957_v10, %v1186_v21  ;;  %v1722_v61 = vmul.f32 %v2957_v10, %v1290_v58 }
  0xf8   :  { %v769_v12 = vsel %vm767_vm2, %v768_v32, %v1951_v62  ;;  %v851_v3 = vor.u32 4788187, %v850_v30  ;;  %v854_v34 = vcvt.s32.f32 %v847_v8  ;;  %v1600_v24 = vsel %vm1598_vm15, %v768_v32, %v1951_v62 }
  0xf9   :  { %v766_v47 = vsel %vm764_vm1, %v1949_v57, %v765_v18  ;;  %v1597_v56 = vsel %vm1595_vm13, %v1949_v57, %v765_v18  ;;  %v1723_v40 = vmul.f32 %v2957_v10, %v1394_v29  ;;  %v1724_v17 = vmul.f32 %v2957_v10, %v1498_v55 }
  0xfa   :  { %v770_v1 = vsel %vm763_vm14, %v766_v47, %v769_v12  ;;  %v852_v36 = vand.u32 2147483647, %v851_v3  ;;  %v1601_v4 = vsel %vm1594_vm3, %v1597_v56, %v1600_v24  ;;  %v1727_v14 = vadd.f32 %v1719_v43, %v1709_v6 }
  0xfb   :  { %v771_v50 = vsel %vm761_vm9, nan, %v770_v1  ;;  %v1602_v19 = vsel %vm761_vm9, nan, %v1601_v4  ;;  %v1728_v25 = vadd.f32 %v1720_v41, %v1710_v51  ;;  %v1729_v16 = vadd.f32 %v1721_v39, %v1711_v5 }
  0xfc   :  { %v855_v20 = vmul.f32 %v854_v34, %v852_v36  ;;  %v1715_v37 = vmul.f32 %v2919_v23, %v771_v50  ;;  %v1725_v38 = vmul.f32 %v2957_v10, %v1602_v19  ;;  %v1730_v7 = vadd.f32 %v1722_v61, %v1712_v13 }
  0xfd   :  { %v861_v27 = vsel %vm2941_vm11, 0, %v859_v9  ;;  %v1731_v11 = vadd.f32 %v1723_v40, %v1713_v26  ;;  %v1732_v42 = vadd.f32 %v1724_v17, %v1714_v54  ;;  %v2987_v44 = vstv %s2959_s3 }
  0xfe   :  { %v856_v48 = vxor.u32 2147483648, %v855_v20  ;;  %v1733_v49 = vadd.f32 %v1725_v38, %v1715_v37  ;;  %v1737_v59 = vadd.f32 %v2987_v44, %v1727_v14  ;;  %v1738_v53 = vadd.f32 %v2987_v44, %v1728_v25 }
  0xff   :  { %v1739_v60 = vadd.f32 %v2987_v44, %v1729_v16  ;;  %v1740_v33 = vadd.f32 %v2987_v44, %v1730_v7  ;;  %v1741_v21 = vadd.f32 %v2987_v44, %v1731_v11  ;;  %v1742_v46 = vadd.f32 %v2987_v44, %v1732_v42 }
 0x100   :  { %v857_v9 = vsel %vm774_vm0, %v856_v48, %v855_v20  ;;  %v1743_v45 = vadd.f32 %v2987_v44, %v1733_v49  ;;  %v1745_v58 = vsub.f32 0.0, %v1737_v59  ;;  %v1746_v29 = vsub.f32 0.0, %v1738_v53 }
 0x101   :  { %v860_v31 = vsel %vm2941_vm11, %v2299_v63, %v857_v9  ;;  %v1747_v15 = vsub.f32 0.0, %v1739_v60  ;;  %v1748_v28 = vsub.f32 0.0, %v1740_v33  ;;  %v1749_v0 = vsub.f32 0.0, %v1741_v21 }
 0x102   :  { %1952 = vcosq.f32 %v860_v31  ;;  %v1750_v6 = vsub.f32 0.0, %v1742_v46  ;;  %v1751_v55 = vsub.f32 0.0, %v1743_v45  ;;  %v1753_v22 = vmul.f32 1.442695, %v1745_v58 }
 0x103   :  { %1954 = vsinq.f32 %v860_v31  ;;  %v1755_v35 = vmul.f32 1.442695, %v1746_v29  ;;  %v1757_v2 = vmul.f32 1.442695, %v1747_v15  ;;  %v1759_v51 = vmul.f32 1.442695, %v1748_v28 }
 0x104   :  { %v1696_v5 = vadd.s32 3, %v861_v27  ;;  %1956 = vpow2.f32 %v1753_v22  ;;  %v1761_v57 = vmul.f32 1.442695, %v1749_v0  ;;  %v1763_v13 = vmul.f32 1.442695, %v1750_v6 }
 0x105   :  { %1958 = vpow2.f32 %v1755_v35  ;;  %v1765_v26 = vmul.f32 1.442695, %v1751_v55  ;;  %v865_v52 = vand.u32 3, %v861_v27  ;;  %vm864_vm6 = vweird.f32 %v2299_v63 }
 0x106   :  { %1960 = vpow2.f32 %v1757_v2  ;;  %v1697_v54 = vand.u32 3, %v1696_v5 }
 0x107   :  { %1962 = vpow2.f32 %v1759_v51  ;;  %vm870_vm8 = vcmp.eq.s32.totalorder %v865_v52, 2  ;;  %vm867_vm12 = vcmp.eq.s32.totalorder %v865_v52, 0  ;;  %vm866_vm1 = vcmp.lt.s32.totalorder %v865_v52, 2 }
 0x108   :  { %1964 = vpow2.f32 %v1761_v57  ;;  %vm1702_vm0 = vcmp.eq.s32.totalorder %v1697_v54, 2  ;;  %vm1699_vm2 = vcmp.eq.s32.totalorder %v1697_v54, 0  ;;  %vm1698_vm4 = vcmp.lt.s32.totalorder %v1697_v54, 2 }
 0x109   :  { %1966 = vpow2.f32 %v1763_v13 }
 0x10a   :  { %1968 = vpow2.f32 %v1765_v26 }
 0x10c   :  { %v1953_v62 = vpop.eup %1952 }
 0x10d   :  { %v1955_v32 = vpop.eup %1954  ;;  %v871_v8 = vxor.u32 2147483648, %v1953_v62 }
 0x10e   :  { %v1957_v30 = vpop.eup %1956  ;;  %v868_v43 = vxor.u32 2147483648, %v1955_v32 }
 0x10f   :  { %v1959_v18 = vpop.eup %1958  ;;  %v872_v41 = vsel %vm870_vm8, %v871_v8, %v1955_v32  ;;  %v1704_v39 = vsel %vm1702_vm0, %v871_v8, %v1955_v32  ;;  %v1769_v61 = vadd.f32 1.0, %v1957_v30 }
 0x110   :  { %v1961_v12 = vpop.eup %1960  ;;  %v869_v3 = vsel %vm867_vm12, %v1953_v62, %v868_v43  ;;  %v1701_v34 = vsel %vm1699_vm2, %v1953_v62, %v868_v43  ;;  %v1770_v24 = vadd.f32 1.0, %v1959_v18 }
 0x111   :  { %v1963_v47 = vpop.eup %1962  ;;  %v873_v56 = vsel %vm866_vm1, %v869_v3, %v872_v41  ;;  %v1705_v40 = vsel %vm1698_vm4, %v1701_v34, %v1704_v39  ;;  %v1771_v17 = vadd.f32 1.0, %v1961_v12  ;;  %1970 = vrcp.f32 %v1769_v61 }
 0x112   :  { %v1965_v1 = vpop.eup %1964  ;;  %v874_v36 = vsel %vm864_vm6, nan, %v873_v56  ;;  %v1706_v4 = vsel %vm864_vm6, nan, %v1705_v40  ;;  %v1772_v14 = vadd.f32 1.0, %v1963_v47  ;;  %1972 = vrcp.f32 %v1770_v24 }
 0x113   :  { %v1967_v50 = vpop.eup %1966  ;;  %v1716_v63 = vmul.f32 %v2919_v23, %v874_v36  ;;  %v1726_v19 = vmul.f32 %v2957_v10, %v1706_v4  ;;  %v1773_v25 = vadd.f32 1.0, %v1965_v1  ;;  %1974 = vrcp.f32 %v1771_v17 }
 0x114   :  { %v1969_v16 = vpop.eup %1968  ;;  %v1774_v20 = vadd.f32 1.0, %v1967_v50  ;;  %1976 = vrcp.f32 %v1772_v14 }
 0x115   :  { %v1734_v37 = vadd.f32 %v1726_v19, %v1716_v63  ;;  %v1775_v38 = vadd.f32 1.0, %v1969_v16  ;;  %1978 = vrcp.f32 %v1773_v25 }
 0x116   :  { %1980 = vrcp.f32 %v1774_v20 }
 0x117   :  { %v1744_v7 = vadd.f32 %v2987_v44, %v1734_v37  ;;  %1982 = vrcp.f32 %v1775_v38 }
 0x119   :  { %v1752_v27 = vsub.f32 0.0, %v1744_v7 }
 0x11b   :  { %v1971_v11 = vpop.eup %1970  ;;  %v1767_v42 = vmul.f32 1.442695, %v1752_v27 }
 0x11c   :  { %v1973_v48 = vpop.eup %1972  ;;  %1793 = vst [vmem:[#allocation7] sm:$0xff] %v1971_v11 }
 0x11d   :  { %v1975_v23 = vpop.eup %1974  ;;  %1984 = vpow2.f32 %v1767_v42  ;;  %1794 = vst [vmem:[#allocation7 + $0x8] sm:$0xff] %v1973_v48 }
 0x11e   :  { %v1977_v10 = vpop.eup %1976  ;;  %1795 = vst [vmem:[#allocation7 + $0x10] sm:$0xff] %v1975_v23 }
 0x11f   :  { %v1979_v49 = vpop.eup %1978  ;;  %1796 = vst [vmem:[#allocation7 + $0x18] sm:$0xff] %v1977_v10 }
 0x120   :  { %v1981_v59 = vpop.eup %1980  ;;  %1797 = vst [vmem:[#allocation7 + $0x20] sm:$0xff] %v1979_v49 }
 0x121   :  { %v1983_v53 = vpop.eup %1982  ;;  %1798 = vst [vmem:[#allocation7 + $0x28] sm:$0xff] %v1981_v59 }
 0x122   :  { %1799 = vst [vmem:[#allocation7 + $0x30] sm:$0xff] %v1983_v53 }
 0x127   :  { %v1985_v60 = vpop.eup %1984 }
 0x128   :  { %v1776_v44 = vadd.f32 1.0, %v1985_v60 }
 0x12a   :  { %1986 = vrcp.f32 %v1776_v44 }
 0x134   :  { %v1987_v33 = vpop.eup %1986 }
 0x135   :  { %1800 = vst [vmem:[#allocation7 + $0x38] sm:$0xff] %v1987_v33 }
 0x136   :  { %2031 = shalt.err (!%p2028_p1)
}
 0x137   :  { %s2032_s9 = scalar_lea.hbm %s3019_s2, 1024 }
 0x138   :  { %p2033_p2 = scmp.ne.s32.totalorder %s3019_s2, %s2032_s9  ;;  %p2036_p3 = scmp.lt.u32.totalorder %s2032_s9, %s3019_s2 }
 0x13a   :  { %p2038_p4 = pnand %p2036_p3, %p2033_p2 }
 0x13c   :  { %2041 = shalt.err (!%p2038_p4)
}
 0x13d   :  { %1810 = dma.vmem_to_hbm [thread:$0]  %s1808_s5, 1024, %s3019_s2, [#allocation4]  }
 0x13e   :  { %2046 = dma.done.wait [#allocation4], 1024  }
 0x13f   :  { %2047 = vsyncadd [#allocation4], 4294966272 }
 0x140   :  { %1814 = vsyncpa [#allocation3], 1 }
 0x141   :  { %1815 = vsyncpa [#allocation4], 1 }
 0x142   :  { %1816 = vsyncpa [#allocation5], 1 }

</bundles_post_ra>
